<compile_context>
chip_gen: v7x
topology: tpu7x:2x2x1
jax: 0.10.0
libtpu: 0.0.40
codegen_flags: <defaults>
</compile_context>

<pallas_src>
import jax
import jax.numpy as jnp
from jax.experimental import pallas as pl
from jax.experimental.pallas import tpu as pltpu


def masked_fill_kernel(x_ref, mask_ref, o_ref):
    x = x_ref[...]
    m = mask_ref[...]
    # out = 42.0 where mask else (x + x); scalar fill broadcasts in the select.
    o_ref[...] = jnp.where(m != 0, jnp.float32(42.0), x + x)


def _simple_masked_fill_impl(tensor, mask):
    """tensor: float32 NCHW array, mask: bool array of the same shape."""
    assert tensor.shape == mask.shape, "kernel expects same-shape mask"
    n, c, h, w = tensor.shape
    # Flatten to a lane-dense 2-D slab (rows, lanes); H*W = 256 is a multiple
    # of 128, so stores are unmasked full-lane vst.
    rows, lanes = n * c, h * w
    x2d = tensor.reshape(rows, lanes)
    # Keep the mask at 1 byte/elem. Under jit this narrow cast fuses with the
    # reshape into a single tiny fusion feeding the custom call.
    m2d = mask.reshape(rows, lanes).astype(jnp.uint8)

    nelem = rows * lanes
    out2d = pl.pallas_call(
        masked_fill_kernel,
        out_shape=jax.ShapeDtypeStruct((rows, lanes), tensor.dtype),
        # No grid: single full-array block resident in VMEM.
        in_specs=[
            pl.BlockSpec(memory_space=pltpu.MemorySpace.VMEM),
            pl.BlockSpec(memory_space=pltpu.MemorySpace.VMEM),
        ],
        out_specs=pl.BlockSpec(memory_space=pltpu.MemorySpace.VMEM),
        # Output has same shape/dtype as x2d and x2d is donated/dead after the
        # call: reuse its buffer (realized because the jit wrapper donates arg 0).
        input_output_aliases={0: 0},
        cost_estimate=pl.CostEstimate(
            flops=nelem,                       # one add per element
            transcendentals=0,
            bytes_accessed=nelem * (4 + 1 + 4),  # x(f32) + mask(u8) + out(f32)
        ),
    )(x2d, m2d)

    return out2d.reshape(n, c, h, w)


# Donate the tensor argument so the in-kernel alias removes the separate HBM
# output allocation. Callers must not reuse `tensor` after this call.
simple_masked_fill = jax.jit(_simple_masked_fill_impl, donate_argnums=0)


if __name__ == "__main__":
    key = jax.random.PRNGKey(0)
    k_x, k_m = jax.random.split(key)

    # NCHW input consistent with the test-style shapes.
    x = jax.random.normal(k_x, (2, 4, 16, 16), dtype=jnp.float32)
    mask = jax.random.bernoulli(k_m, p=0.3, shape=(2, 4, 16, 16))

    # Reference (plain JAX semantics of torch.masked_fill) computed BEFORE the
    # kernel call since `x` is donated to the jitted wrapper.
    ref = jnp.where(mask, jnp.float32(42.0), x + x)
    ref = jax.block_until_ready(ref)

    out = simple_masked_fill(x, mask)
    out = jax.block_until_ready(out)

    assert out.shape == (2, 4, 16, 16)
    assert out.dtype == jnp.float32
    assert jnp.allclose(out, ref), "mismatch vs reference"

    print("KERNEL_OK")
</pallas_src>

<mosaic_0001>
module attributes {stable_mosaic.version = 11 : i64} {
  func.func @masked_fill_kernel(%arg0: memref<8x256xf32, #tpu.memory_space<vmem>>, %arg1: memref<8x256xi8, #tpu.memory_space<vmem>>, %arg2: memref<8x256xf32, #tpu.memory_space<vmem>>) attributes {dimension_semantics = [], scalar_prefetch = 0 : i64, scratch_operands = 0 : i64, tpu.core_type = #tpu.core_type<tc>} {
    %c0 = arith.constant 0 : index
    %c0_0 = arith.constant 0 : index
    %0 = vector.load %arg0[%c0, %c0_0] : memref<8x256xf32, #tpu.memory_space<vmem>>, vector<8x256xf32>
    %c0_1 = arith.constant 0 : index
    %c0_2 = arith.constant 0 : index
    %1 = vector.load %arg1[%c0_1, %c0_2] : memref<8x256xi8, #tpu.memory_space<vmem>>, vector<8x256xi8>
    %c0_i8 = arith.constant 0 : i8
    %2 = vector.broadcast %c0_i8 : i8 to vector<8x256xi8>
    %3 = arith.cmpi ne, %1, %2 : vector<8x256xi8>
    %4 = arith.addf %0, %0 : vector<8x256xf32>
    %cst = arith.constant 4.200000e+01 : f32
    %5 = vector.broadcast %cst : f32 to vector<8x256xf32>
    %6 = arith.select %3, %5, %4 : vector<8x256xi1>, vector<8x256xf32>
    %c0_3 = arith.constant 0 : index
    %c0_4 = arith.constant 0 : index
    %7 = vector.load %arg2[%c0_3, %c0_4] : memref<8x256xf32, #tpu.memory_space<vmem>>, vector<8x256xf32>
    tpu.vector_store %arg2[%c0_3, %c0_4], %6 {strides = array<i32>} : memref<8x256xf32, #tpu.memory_space<vmem>>, vector<8x256xf32>,
    return
  }
}

</mosaic_0001>

<bundles_post_ra>
// kernel: _simple_masked_fill_impl.1
= control target key start
LH: loop header
LB: loop body
LE: loop exit
PB: predicated region body
PF: predicated region fallthrough
CT: control target
= control target key end

     0   :  { %v33_v4 = vmov 0   ;;  %s64_s0 = inlined_call_operand.vmem [shape: f32[8,256], index: 0, kind: input, shape index: {}, may-alias: {0,2}]   ;;  %s65_s1 = inlined_call_operand.vmem [shape: u8[8,256], index: 1, kind: input, shape index: {}]   ;;  %s66_s2 = inlined_call_operand.vmem [shape: f32[8,256], index: 2, kind: output, shape index: {}, may-alias: {0,2}]  }
   0x1   :  { %v13_v0 = vld [vmem:[%s64_s0] sm:$0xff]  ;;  %v14_v2 = vld [vmem:[%s64_s0 + $0x8] sm:$0xff] }
   0x2   :  { %v15_v1 = vld [vmem:[%s65_s1] sm:$0xf]  ;;  %v17_v3 = vadd.f32 %v13_v0, %v13_v0  ;;  %v18_v6 = vadd.f32 %v14_v2, %v14_v2 }
   0x3   :  { %vm16_vm0 = vnez %v15_v1 }
   0x4   :  { %v19_v5 = vsel %vm16_vm0, 16843009, %v33_v4 }
   0x5   :  { %v20_v7 = vunpack.c.0.s8 %v19_v5  ;;  %v21_v8 = vunpack.c.1.s8 %v19_v5 }
   0x7   :  { %vm22_vm1 = vcmp.ne.s32.totalorder %v20_v7, 0  ;;  %vm23_vm2 = vcmp.ne.s32.totalorder %v21_v8, 0 }
   0x8   :  { %v24_v9 = vsel %vm22_vm1, 42.0, %v17_v3  ;;  %v25_v10 = vsel %vm23_vm2, 42.0, %v18_v6 }
   0x9   :  { %26 = vst [vmem:[%s66_s2] sm:$0xff] %v24_v9  ;;  %27 = vst [vmem:[%s66_s2 + $0x8] sm:$0xff] %v25_v10 }

</bundles_post_ra>
